<compile_context>
chip_gen: v6e
topology: v6e:2x2x1
jax: 0.10.0
libtpu: 0.0.40
codegen_flags: <defaults>
</compile_context>

<pallas_src>
import functools

import jax
import jax.numpy as jnp
from jax.experimental import pallas as pl
from jax.experimental.pallas import tpu as pltpu


OUT_DTYPE = jnp.float32   # matches the PyTorch module; bf16 halves writeback


def _round_up(x, m):
    return ((x + m - 1) // m) * m


def _cdiv(a, b):
    return -(-a // b)


def _patch_conv_kernel(x_ref, w_ref, b_ref, o_ref):
    # x_ref: (TM, K)   bf16 flattened patches (one M-tile)
    # w_ref: (K, TN)   bf16 conv weight tile
    # b_ref: (1, TN)   f32  conv bias tile
    # o_ref: (TM, TN)  per-patch embeddings
    acc = jnp.dot(x_ref[...], w_ref[...], preferred_element_type=jnp.float32)
    # bias add kept in f32 (accumulator dtype) -> safe VPU path on all gens.
    o_ref[...] = (acc + b_ref[...]).astype(o_ref.dtype)


def _choose_tiling(M, K, O):
    """Pick (tm, Mp, tn, Op) under a conservative VMEM budget."""
    Op = _round_up(O, 128)
    # N tile: largest multiple of 128 that divides Op, keeps the bf16 weight
    # tile <= ~4 MiB (v7x-friendly) and the tile width <= 1024.
    tn = 128
    t = 128
    while t <= min(Op, 1024):
        if Op % t == 0 and K * t * 2 <= 4 * 2 ** 20:
            tn = t
        t += 128
    # M tile: as big as the budget allows (amortize ~0.35us/grid-step), but
    # always >= 2 steps so v7x's two TensorCores both get work.
    budget = 24 * 2 ** 20
    resident = 2 * (K * tn * 2 + tn * 4)        # weight + bias, worst-case 2 bufs
    row_bytes = 2 * K * 2 + 2 * tn * 4          # patch dbuf + f32 out dbuf per row
    tm_cap = min(1024, max(8, (budget - resident) // row_bytes))
    n_steps = max(2, _cdiv(M, tm_cap))
    tm = _round_up(_cdiv(M, n_steps), 8)
    Mp = tm * n_steps
    return tm, Mp, tn, Op


def _patch_conv_matmul(patch_rows, w_mat_bf16, bias, *, M, O, tm, Mp, tn, Op,
                       single_buffer_resident):
    """patch_rows: (Mp, K) bf16; w_mat_bf16: (K, O) bf16; bias: (O,) f32 -> (Mp, Op)."""
    K = patch_rows.shape[1]
    out_itemsize = jnp.dtype(OUT_DTYPE).itemsize

    # Pad only the small operands (weight/bias) to a lane-dense Op.
    w_p = jnp.pad(w_mat_bf16, ((0, 0), (0, Op - O)))
    b_p = jnp.pad(bias.astype(jnp.float32), (0, Op - O)).reshape(1, Op)

    n_grid, m_grid = Op // tn, Mp // tm
    resident_kwargs = {}
    n_w_bufs = 2
    if single_buffer_resident and n_grid == 1:
        # Constant index_map -> one buffer is enough; halves resident VMEM.
        resident_kwargs = dict(pipeline_mode=pl.Buffered(buffer_count=1))
        n_w_bufs = 1

    vmem_bytes = (2 * tm * K * 2                          # patch tiles (double buffered)
                  + n_w_bufs * (K * tn * 2 + tn * 4)      # weight + bias tiles
                  + 2 * tm * tn * out_itemsize)           # output tiles (double buffered)
    vmem_limit = int(min(96 * 2 ** 20, max(32 * 2 ** 20, 2 * vmem_bytes)))

    return pl.pallas_call(
        _patch_conv_kernel,
        out_shape=jax.ShapeDtypeStruct((Mp, Op), OUT_DTYPE),
        grid=(n_grid, m_grid),          # N outer: weight tile constant across inner M loop
        in_specs=[
            pl.BlockSpec((tm, K), lambda n, m: (m, 0)),                     # patches
            pl.BlockSpec((K, tn), lambda n, m: (0, n), **resident_kwargs),  # weight
            pl.BlockSpec((1, tn), lambda n, m: (0, n), **resident_kwargs),  # bias
        ],
        out_specs=pl.BlockSpec((tm, tn), lambda n, m: (m, n)),
        compiler_params=pltpu.CompilerParams(
            dimension_semantics=("parallel", "parallel"),
            vmem_limit_bytes=vmem_limit),
        cost_estimate=pl.CostEstimate(
            flops=2 * Mp * K * Op,
            transcendentals=0,
            bytes_accessed=(n_grid * Mp * K * 2 + K * Op * 2 + Op * 4
                            + Mp * Op * out_itemsize)),
    )(patch_rows, w_p, b_p)


@functools.partial(jax.jit, static_argnames=("ph", "pw", "cfg"))
def _forward_impl(x, b_idx, sh_idx, sw_idx, weight, bias, *, ph, pw, cfg):
    (B, num_patches, M, O, tm, Mp, tn, Op, single_buffer) = cfg
    C = x.shape[1]

    # Cast once, before the gather -> halves gather + kernel-LHS HBM bytes.
    x_bf = x.astype(jnp.bfloat16)

    def gather_one(b, sh, sw):
        patch = jax.lax.dynamic_slice(x_bf, (b, 0, sh, sw), (1, C, ph, pw))
        return patch.reshape(-1)                                   # (C*ph*pw,) bf16

    # Index arrays are pre-padded to Mp with in-bounds dummies, so the gather
    # directly yields the (Mp, K) bf16 kernel operand (no second padded-copy
    # pass over the patch matrix).
    patch_rows = jax.vmap(gather_one)(b_idx, sh_idx, sw_idx)       # (Mp, K)

    # conv weight (O, C, P, P) -> (K, O); conv == inner product here.
    w_mat = weight.reshape(O, -1).T.astype(jnp.bfloat16)           # (K, O)

    out_p = _patch_conv_matmul(patch_rows, w_mat, bias,
                               M=M, O=O, tm=tm, Mp=Mp, tn=tn, Op=Op,
                               single_buffer_resident=single_buffer)

    # Fold the M/O un-padding into the final reshape (one fused copy).
    return out_p[:M, :O].reshape(B, num_patches, O)


class CustomConv2DPallas:
    """JAX/Pallas port of CustomConv2D.forward.

    Returns (batch, num_patches, output_channels): the stacked `all_images`
    tensor of the PyTorch module (each patch's conv output flattened to
    out_channels, since kernel == stride == patch size).
    """

    def __init__(self, input_channels, output_channels, patch_size, key):
        self.in_c = input_channels
        self.out_c = output_channels
        self.patch_size = patch_size
        P = patch_size[0]
        kw, kb = jax.random.split(key)
        # Deterministic init matching nn.Conv2d shapes: W (O, C, P, P), b (O,)
        fan_in = input_channels * P * P
        bound = 1.0 / jnp.sqrt(fan_in)
        self.weight = jax.random.uniform(
            kw, (output_channels, input_channels, P, P),
            minval=-bound, maxval=bound, dtype=jnp.float32)
        self.bias = jax.random.uniform(
            kb, (output_channels,), minval=-bound, maxval=bound,
            dtype=jnp.float32)

    def forward(self, x, centers_per_image):
        """x: (B, C, H, W) f32 (NCHW, like PyTorch).
        centers_per_image: list (length B) of lists of (h, w) int centers.
        All images must provide the same number of (in-bounds) centers so the
        stacked output has a static shape."""
        B, C, H, W = x.shape
        Ph, Pw = self.patch_size

        num_patches = len(centers_per_image[0])
        assert all(len(c) == num_patches for c in centers_per_image), (
            "all images must have the same number of centers")

        # --- glue: per-patch slice starts (static, in-bounds centers) ---
        b_idx, sh_idx, sw_idx = [], [], []
        for b in range(B):
            for (h_c, w_c) in centers_per_image[b]:
                sh = int(h_c) - Ph // 2
                sw = int(w_c) - Pw // 2
                # TODO(synk): original skips out-of-bounds patches at runtime;
                # here we require in-bounds centers to keep shapes static.
                assert 0 <= sh and sh + Ph <= H
                assert 0 <= sw and sw + Pw <= W
                b_idx.append(b)
                sh_idx.append(sh)
                sw_idx.append(sw)

        M = len(b_idx)                       # = B * num_patches
        K = C * Ph * Pw
        tm, Mp, tn, Op = _choose_tiling(M, K, self.out_c)

        # Pad the gather INDICES (not the patch matrix) with in-bounds dummies
        # so the gather output is already M-padded for the kernel grid.
        pad = Mp - M
        b_idx += [0] * pad
        sh_idx += [0] * pad
        sw_idx += [0] * pad
        b_arr = jnp.asarray(b_idx, jnp.int32)
        sh_arr = jnp.asarray(sh_idx, jnp.int32)
        sw_arr = jnp.asarray(sw_idx, jnp.int32)

        cfg_base = (B, num_patches, M, self.out_c, tm, Mp, tn, Op)
        try:
            return _forward_impl(x, b_arr, sh_arr, sw_arr, self.weight,
                                 self.bias, ph=Ph, pw=Pw, cfg=cfg_base + (True,))
        except Exception:
            # Fallback if pl.Buffered(1) (single-buffered resident weight) is
            # not supported by this jax/libtpu build.
            return _forward_impl(x, b_arr, sh_arr, sw_arr, self.weight,
                                 self.bias, ph=Ph, pw=Pw, cfg=cfg_base + (False,))


if __name__ == "__main__":
    key = jax.random.PRNGKey(0)
    k_x, k_params = jax.random.split(key)

    # Small shapes consistent with the module.
    batch, channels, height, width = 2, 4, 16, 16
    output_channels = 8
    patch_size = (4, 4)

    x = jax.random.normal(k_x, (batch, channels, height, width),
                          dtype=jnp.float32)

    # Deterministic synthetic "segmentation centers" (all in-bounds).
    centers = [
        [(4, 4), (4, 12), (12, 4), (12, 12)],   # image 0
        [(5, 5), (5, 11), (11, 5), (11, 11)],   # image 1
    ]

    model = CustomConv2DPallas(channels, output_channels, patch_size, k_params)
    out = model.forward(x, centers)
    out = jax.block_until_ready(out)

    # Sanity check vs. plain-JAX references (same patch gather; bf16-input /
    # f32-accumulate math path mirrors the kernel).
    rows = []
    for b in range(batch):
        for (h, w) in centers[b]:
            sh, sw = h - patch_size[0] // 2, w - patch_size[1] // 2
            rows.append(x[b, :, sh:sh + patch_size[0],
                          sw:sw + patch_size[1]].reshape(-1))
    rows = jnp.stack(rows)                               # (M, K) f32
    w_mat_ref = model.weight.reshape(output_channels, -1).T
    ref_bf16 = (jnp.dot(rows.astype(jnp.bfloat16),
                        w_mat_ref.astype(jnp.bfloat16),
                        preferred_element_type=jnp.float32)
                + model.bias).reshape(batch, len(centers[0]), output_channels)
    ref_f32 = (rows @ w_mat_ref + model.bias).reshape(
        batch, len(centers[0]), output_channels)

    assert out.shape == (batch, len(centers[0]), output_channels)
    assert jnp.allclose(out, ref_bf16, atol=1e-3, rtol=1e-3)   # same math path
    assert jnp.allclose(out, ref_f32, atol=5e-2, rtol=5e-2)    # bf16-input error bound

    print("KERNEL_OK")
</pallas_src>

<mosaic_0001>
module attributes {stable_mosaic.version = 11 : i64} {
  func.func @_patch_conv_kernel(%arg0: i32, %arg1: i32, %arg2: memref<8x64xbf16, #tpu.memory_space<vmem>>, %arg3: memref<64x128xbf16, #tpu.memory_space<vmem>>, %arg4: memref<1x128xf32, #tpu.memory_space<vmem>>, %arg5: memref<8x128xf32, #tpu.memory_space<vmem>>) attributes {dimension_semantics = [#tpu.dimension_semantics<parallel>, #tpu.dimension_semantics<parallel>], iteration_bounds = array<i64: 1, 2>, scalar_prefetch = 0 : i64, scratch_operands = 0 : i64, tpu.core_type = #tpu.core_type<tc>, window_params = [{transform_indices = @transform_0, window_bounds = array<i64: 8, 64>}, {pipeline_mode = #tpu.pipeline_mode<synchronous>, transform_indices = @transform_1, window_bounds = array<i64: 64, 128>}, {pipeline_mode = #tpu.pipeline_mode<synchronous>, transform_indices = @transform_2, window_bounds = array<i64: 1, 128>}, {transform_indices = @transform_3, window_bounds = array<i64: 8, 128>}]} {
    %c0 = arith.constant 0 : index
    %c0_0 = arith.constant 0 : index
    %0 = vector.load %arg2[%c0, %c0_0] : memref<8x64xbf16, #tpu.memory_space<vmem>>, vector<8x64xbf16>
    %c0_1 = arith.constant 0 : index
    %c0_2 = arith.constant 0 : index
    %1 = vector.load %arg3[%c0_1, %c0_2] : memref<64x128xbf16, #tpu.memory_space<vmem>>, vector<64x128xbf16>
    %cst = arith.constant dense<0.000000e+00> : vector<8x128xf32>
    %2 = tpu.matmul %0, %1, %cst {dimension_numbers = #tpu.dot_dimension_numbers<[1], [0], [0], [1], [0, 0, 1, 1], [], []>} : vector<8x64xbf16>, vector<64x128xbf16>, vector<8x128xf32> -> vector<8x128xf32>
    %c0_3 = arith.constant 0 : index
    %c0_4 = arith.constant 0 : index
    %3 = vector.load %arg4[%c0_3, %c0_4] : memref<1x128xf32, #tpu.memory_space<vmem>>, vector<1x128xf32>
    %4 = vector.broadcast %3 : vector<1x128xf32> to vector<8x128xf32>
    %5 = arith.addf %2, %4 : vector<8x128xf32>
    %c0_5 = arith.constant 0 : index
    %c0_6 = arith.constant 0 : index
    %6 = vector.load %arg5[%c0_5, %c0_6] : memref<8x128xf32, #tpu.memory_space<vmem>>, vector<8x128xf32>
    tpu.vector_store %arg5[%c0_5, %c0_6], %5 {strides = array<i32>} : memref<8x128xf32, #tpu.memory_space<vmem>>, vector<8x128xf32>,
    return
  }
  func.func @transform_0(%arg0: i32, %arg1: i32) -> (i32, i32) {
    %c0_i32 = arith.constant 0 : i32
    %c0_i32_0 = arith.constant 0 : i32
    return %arg1, %c0_i32 : i32, i32
  }
  func.func @transform_1(%arg0: i32, %arg1: i32) -> (i32, i32) {
    %c0_i32 = arith.constant 0 : i32
    %c0_i32_0 = arith.constant 0 : i32
    return %c0_i32, %arg0 : i32, i32
  }
  func.func @transform_2(%arg0: i32, %arg1: i32) -> (i32, i32) {
    %c0_i32 = arith.constant 0 : i32
    %c0_i32_0 = arith.constant 0 : i32
    return %c0_i32, %arg0 : i32, i32
  }
  func.func @transform_3(%arg0: i32, %arg1: i32) -> (i32, i32) {
    %c0_i32 = arith.constant 0 : i32
    return %arg1, %arg0 : i32, i32
  }
}

module attributes {stable_mosaic.version = 11 : i64} {
  func.func @_patch_conv_kernel(%arg0: i32, %arg1: i32, %arg2: memref<8x64xbf16, #tpu.memory_space<vmem>>, %arg3: memref<64x128xbf16, #tpu.memory_space<vmem>>, %arg4: memref<1x128xf32, #tpu.memory_space<vmem>>, %arg5: memref<8x128xf32, #tpu.memory_space<vmem>>) attributes {dimension_semantics = [#tpu.dimension_semantics<parallel>, #tpu.dimension_semantics<parallel>], iteration_bounds = array<i64: 1, 2>, scalar_prefetch = 0 : i64, scratch_operands = 0 : i64, tpu.core_type = #tpu.core_type<tc>, window_params = [{transform_indices = @transform_0, window_bounds = array<i64: 8, 64>}, {transform_indices = @transform_1, window_bounds = array<i64: 64, 128>}, {transform_indices = @transform_2, window_bounds = array<i64: 1, 128>}, {transform_indices = @transform_3, window_bounds = array<i64: 8, 128>}]} {
    %c0 = arith.constant 0 : index
    %c0_0 = arith.constant 0 : index
    %0 = vector.load %arg2[%c0, %c0_0] : memref<8x64xbf16, #tpu.memory_space<vmem>>, vector<8x64xbf16>
    %c0_1 = arith.constant 0 : index
    %c0_2 = arith.constant 0 : index
    %1 = vector.load %arg3[%c0_1, %c0_2] : memref<64x128xbf16, #tpu.memory_space<vmem>>, vector<64x128xbf16>
    %cst = arith.constant dense<0.000000e+00> : vector<8x128xf32>
    %2 = tpu.matmul %0, %1, %cst {dimension_numbers = #tpu.dot_dimension_numbers<[1], [0], [0], [1], [0, 0, 1, 1], [], []>} : vector<8x64xbf16>, vector<64x128xbf16>, vector<8x128xf32> -> vector<8x128xf32>
    %c0_3 = arith.constant 0 : index
    %c0_4 = arith.constant 0 : index
    %3 = vector.load %arg4[%c0_3, %c0_4] : memref<1x128xf32, #tpu.memory_space<vmem>>, vector<1x128xf32>
    %4 = vector.broadcast %3 : vector<1x128xf32> to vector<8x128xf32>
    %5 = arith.addf %2, %4 : vector<8x128xf32>
    %c0_5 = arith.constant 0 : index
    %c0_6 = arith.constant 0 : index
    %6 = vector.load %arg5[%c0_5, %c0_6] : memref<8x128xf32, #tpu.memory_space<vmem>>, vector<8x128xf32>
    tpu.vector_store %arg5[%c0_5, %c0_6], %5 {strides = array<i32>} : memref<8x128xf32, #tpu.memory_space<vmem>>, vector<8x128xf32>,
    return
  }
  func.func @transform_0(%arg0: i32, %arg1: i32) -> (i32, i32) {
    %c0_i32 = arith.constant 0 : i32
    %c0_i32_0 = arith.constant 0 : i32
    return %arg1, %c0_i32 : i32, i32
  }
  func.func @transform_1(%arg0: i32, %arg1: i32) -> (i32, i32) {
    %c0_i32 = arith.constant 0 : i32
    %c0_i32_0 = arith.constant 0 : i32
    return %c0_i32, %arg0 : i32, i32
  }
  func.func @transform_2(%arg0: i32, %arg1: i32) -> (i32, i32) {
    %c0_i32 = arith.constant 0 : i32
    %c0_i32_0 = arith.constant 0 : i32
    return %c0_i32, %arg0 : i32, i32
  }
  func.func @transform_3(%arg0: i32, %arg1: i32) -> (i32, i32) {
    %c0_i32 = arith.constant 0 : i32
    return %arg1, %arg0 : i32, i32
  }
}

</mosaic_0001>

<bundles_post_ra>
// kernel: _forward_impl.1
= control target key start
LH: loop header
LB: loop body
LE: loop exit
PB: predicated region body
PF: predicated region fallthrough
CT: control target
= control target key end

     0   :  { %s512_s12 = smov 0   ;;  %s514_s13 = smov 0   ;;  %s560_s0 = inlined_call_operand.vmem [shape: bf16[16,64], index: 0, kind: input, shape index: {}]   ;;  %s561_s1 = inlined_call_operand.vmem [shape: bf16[64,128], index: 1, kind: input, shape index: {}]   ;;  %s562_s2 = inlined_call_operand.vmem [shape: f32[1,128], index: 2, kind: input, shape index: {}]   ;;  %s563_s3 = inlined_call_operand.vmem [shape: f32[16,128], index: 3, kind: output, shape index: {}]  }
   0x1   :  { %s516_s14 = smov 0  }
   0x2 LB: > { %s22_s15 = sadd.s32 1, %s484_s13  ;;  %p408_p0 = scmp.ge.s32.totalorder %s488_s14, 1  ;;  %s488_s14 = sphi %s516_s14, %s13_s14   ;;  %s484_s13 = sphi %s514_s13, %s565_s13   ;;  %s480_s12 = sphi %s512_s12, %s564_s12  }
   0x3   : > { %p23_p1 = scmp.ge.s32.totalorder %s22_s15, 2  ;;  %p167_p2 = scmp.lt.s32.totalorder %s488_s14, 3 }
   0x5   : > { %s567_s15 = smov (%p23_p1, %s22_s15), 0  ;;  %p168_p3 = pnand %p408_p0, %p167_p2 }
   0x6   : > { %p199_p4 = scmp.lt.s32.totalorder (!%p168_p3), %s480_s12, 1 }
   0x7   : > { %171 = sbr.rel (%p168_p3) target bundleno = 228 (0xe4), region = 32 }
   0xc   : > { %v462_v0 = vld [vmem:[%s561_s1 + $0x18] sm:$0xff]   ;;  %v490_v1 = vmov 0.0   ;;  %v463_v2 = vld [vmem:[%s561_s1 + $0x10] sm:$0xff]   ;;  %vm491_vm0 = vmmov 0   ;;  %s569_s12 = smov (!%p199_p4, %s480_s12), 1  ;;  %v464_v3 = vld [vmem:[%s561_s1 + $0x8] sm:$0xff]  }
   0xd   : > { %424 = vmatprep.subr.bf16.mxu0 %v490_v1  ;;  %432 = vmatprep.mubr.msk.bf16.mxu0 %vm491_vm0, %v490_v1  ;;  %s409_s22 = sshll.u32 %s569_s12, 2  ;;  %v465_v4 = vld [vmem:[%s561_s1] sm:$0xff]   ;;  %vm258_vm1 = vcmask 523264   ;;  %s410_s28 = sshll.u32 %s569_s12, 3 }
   0xe   : > { %425 = vmatpush3.bf16.msra.mxu0 %v462_v0  ;;  %s202_s27 = scalar_lea.vmem %s560_s0, %s409_s22  ;;  %v411_v6 = vld [vmem:[%s562_s2] ss:$0 sm:$0xff]  ;;  %s216_s6 = scalar_lea.vmem %s563_s3, %s410_s28 }
   0xf   : > { %426 = vmatprep.subr.bf16.mxu0 %v490_v1  ;;  %v218_v5 = vld [vmem:[%s202_s27] sm:$0xf] }
  0x12   : > { %427 = vmatpush3.bf16.msra.mxu0 %v463_v2 }
  0x13   : > { %428 = vmatprep.subr.bf16.mxu0 %v490_v1 }
  0x16   : > { %429 = vmatpush3.bf16.msra.mxu0 %v464_v3 }
  0x17   : > { %430 = vmatprep.subr.bf16.mxu0 %v490_v1 }
  0x1a   : > { %431 = vmatpush3.bf16.msra.mxu0 %v465_v4 }
  0x1d   : > { %433 = vmatmul.mubr.msk.bf16.vlgmr.msra.gmra.mxu0 %vm258_vm1, %v218_v5 }
  0xdd   : > { %v296_v7 = vpop.f32.mrf.mxu0 }
  0xde   : > { %v297_v8 = vadd.f32 %v411_v6, %v296_v7 }
  0xdf   : > { %v434_v9 = vpop.f32.mrf.mxu0 }
  0xe0   : > { %302 = vst [vmem:[%s216_s6] sm:$0xff] %v297_v8 }
  0xe1   : > { %v299_v10 = vpop.f32.mrf.mxu0 }
  0xe3   : > { %v435_v11 = vpop.f32.mrf.mxu0 }
  0xe4 PF: > { %s13_s14 = sadd.s32 1, %s488_s14   ;;  %s564_s12 = smov %s484_s13 }
  0xe5   : > { %p10_p5 = scmp.ge.s32.totalorder %s13_s14, 4   ;;  %s565_s13 = smov %s567_s15 }
  0xe7   :  { %12 = sbr.rel (!%p10_p5) target bundleno = 2 (0x2), region = 68 }

// kernel: _forward_impl.1
= control target key start
LH: loop header
LB: loop body
LE: loop exit
PB: predicated region body
PF: predicated region fallthrough
CT: control target
= control target key end

     0   :  { %s512_s12 = smov 0   ;;  %s514_s13 = smov 0   ;;  %s560_s0 = inlined_call_operand.vmem [shape: bf16[16,64], index: 0, kind: input, shape index: {}]   ;;  %s561_s1 = inlined_call_operand.vmem [shape: bf16[64,128], index: 1, kind: input, shape index: {}]   ;;  %s562_s2 = inlined_call_operand.vmem [shape: f32[1,128], index: 2, kind: input, shape index: {}]   ;;  %s563_s3 = inlined_call_operand.vmem [shape: f32[16,128], index: 3, kind: output, shape index: {}]  }
   0x1   :  { %s516_s14 = smov 0  }
   0x2 LB: > { %s22_s15 = sadd.s32 1, %s484_s13  ;;  %p408_p0 = scmp.ge.s32.totalorder %s488_s14, 1  ;;  %s488_s14 = sphi %s516_s14, %s13_s14   ;;  %s484_s13 = sphi %s514_s13, %s565_s13   ;;  %s480_s12 = sphi %s512_s12, %s564_s12  }
   0x3   : > { %p23_p1 = scmp.ge.s32.totalorder %s22_s15, 2  ;;  %p167_p2 = scmp.lt.s32.totalorder %s488_s14, 3 }
   0x5   : > { %s567_s15 = smov (%p23_p1, %s22_s15), 0  ;;  %p168_p3 = pnand %p408_p0, %p167_p2 }
   0x6   : > { %p199_p4 = scmp.lt.s32.totalorder (!%p168_p3), %s480_s12, 1 }
   0x7   : > { %171 = sbr.rel (%p168_p3) target bundleno = 228 (0xe4), region = 32 }
   0xc   : > { %v462_v0 = vld [vmem:[%s561_s1 + $0x18] sm:$0xff]   ;;  %v490_v1 = vmov 0.0   ;;  %v463_v2 = vld [vmem:[%s561_s1 + $0x10] sm:$0xff]   ;;  %vm491_vm0 = vmmov 0   ;;  %s569_s12 = smov (!%p199_p4, %s480_s12), 1  ;;  %v464_v3 = vld [vmem:[%s561_s1 + $0x8] sm:$0xff]  }
   0xd   : > { %424 = vmatprep.subr.bf16.mxu0 %v490_v1  ;;  %432 = vmatprep.mubr.msk.bf16.mxu0 %vm491_vm0, %v490_v1  ;;  %s409_s22 = sshll.u32 %s569_s12, 2  ;;  %v465_v4 = vld [vmem:[%s561_s1] sm:$0xff]   ;;  %vm258_vm1 = vcmask 523264   ;;  %s410_s28 = sshll.u32 %s569_s12, 3 }
   0xe   : > { %425 = vmatpush3.bf16.msra.mxu0 %v462_v0  ;;  %s202_s27 = scalar_lea.vmem %s560_s0, %s409_s22  ;;  %v411_v6 = vld [vmem:[%s562_s2] ss:$0 sm:$0xff]  ;;  %s216_s6 = scalar_lea.vmem %s563_s3, %s410_s28 }
   0xf   : > { %426 = vmatprep.subr.bf16.mxu0 %v490_v1  ;;  %v218_v5 = vld [vmem:[%s202_s27] sm:$0xf] }
  0x12   : > { %427 = vmatpush3.bf16.msra.mxu0 %v463_v2 }
  0x13   : > { %428 = vmatprep.subr.bf16.mxu0 %v490_v1 }
  0x16   : > { %429 = vmatpush3.bf16.msra.mxu0 %v464_v3 }
  0x17   : > { %430 = vmatprep.subr.bf16.mxu0 %v490_v1 }
  0x1a   : > { %431 = vmatpush3.bf16.msra.mxu0 %v465_v4 }
  0x1d   : > { %433 = vmatmul.mubr.msk.bf16.vlgmr.msra.gmra.mxu0 %vm258_vm1, %v218_v5 }
  0xdd   : > { %v296_v7 = vpop.f32.mrf.mxu0 }
  0xde   : > { %v297_v8 = vadd.f32 %v411_v6, %v296_v7 }
  0xdf   : > { %v434_v9 = vpop.f32.mrf.mxu0 }
  0xe0   : > { %302 = vst [vmem:[%s216_s6] sm:$0xff] %v297_v8 }
  0xe1   : > { %v299_v10 = vpop.f32.mrf.mxu0 }
  0xe3   : > { %v435_v11 = vpop.f32.mrf.mxu0 }
  0xe4 PF: > { %s13_s14 = sadd.s32 1, %s488_s14   ;;  %s564_s12 = smov %s484_s13 }
  0xe5   : > { %p10_p5 = scmp.ge.s32.totalorder %s13_s14, 4   ;;  %s565_s13 = smov %s567_s15 }
  0xe7   :  { %12 = sbr.rel (!%p10_p5) target bundleno = 2 (0x2), region = 68 }

</bundles_post_ra>
